<compile_context>
chip_gen: v6e
topology: v6e:2x2x1
jax: 0.10.0
libtpu: 0.0.40
codegen_flags: <defaults>
</compile_context>

<pallas_src>
import math

import jax
import jax.numpy as jnp
from jax.experimental import pallas as pl
from jax.experimental.pallas import tpu as pltpu


def _scaling_kernel(sign_ref, x_ref, scale_ref, y_ref):
    """y = x * exp(sign * scale), scale broadcast over the batch tile.

    sign_ref:  (1,)     f32 in SMEM (+1.0 forward, -1.0 reverse)
    x_ref:     (TB, Dd) input activations tile (lane-dense layout)
    scale_ref: (1, Dd)  f32 (tiled) log-scale row, resident across the grid
    y_ref:     (TB, Dd) output tile
    """
    sign = sign_ref[0]                                   # scalar from SMEM
    f = jnp.exp(sign * scale_ref[...])                   # (1, Dd) on the EUP (idle slot)
    f = f.astype(x_ref.dtype)                            # no-op for f32 inputs
    y_ref[...] = (x_ref[...] * f).astype(y_ref.dtype)    # pure VPU broadcast-multiply


def _lane_dense_layout(B, D):
    """Return (r, D_dense): view (B, D) as (B//r, r*D) with r*D % 128 == 0.

    Returns (1, D) when D is already lane-dense or B is not divisible by r.
    """
    if D % 128 == 0:
        return 1, D
    r = math.lcm(D, 128) // D
    if r > 1 and B % r == 0:
        return r, r * D
    return 1, D


def _sublane_multiple(dtype):
    """Dtype-native sublane packing: 8 for 32-bit, 16 for 16-bit, 32 for 8-bit."""
    bits = jnp.dtype(dtype).itemsize * 8
    if bits >= 32:
        return 8
    if bits == 16:
        return 16
    return 32


def _pick_batch_tile(B, D, dtype, target_bytes=4 * 1024 * 1024):
    """Tile the batch axis so each x block is ~4 MiB.

    Actual resident VMEM is ~4x this (x + y, each double-buffered); the
    wrapper raises vmem_limit_bytes to 32 MiB so this fits every generation.
    """
    sub = _sublane_multiple(dtype)
    itemsize = jnp.dtype(dtype).itemsize
    rows = max(1, target_bytes // max(1, D * itemsize))
    if rows >= B:
        return B                              # whole array in one block (full extent)
    tb = max(sub, (rows // sub) * sub)        # round to the sublane multiple
    return min(tb, B)


def _batch_dim_semantics(grid_size):
    """Plain 'parallel' everywhere; CORE_PARALLEL on v7x (2 TCs per chip)."""
    try:
        kind = jax.devices()[0].device_kind.lower()
    except Exception:  # pragma: no cover - defensive
        kind = ""
    if grid_size >= 2 and "7" in kind and hasattr(pltpu, "CORE_PARALLEL"):
        return (pltpu.CORE_PARALLEL,)
    return ("parallel",)


def scaling_forward(x, scale, reverse=False, *, donate_x=False):
    """Pallas wrapper reproducing Scaling.forward.

    Args:
        x:        (B, D) array.
        scale:    (1, D) array (the log-scale parameter).
        reverse:  if True multiply by exp(-scale), else by exp(scale).
        donate_x: alias x's HBM buffer to the output (only set when the caller
                  no longer needs x, e.g. stacked flow layers).
    Returns:
        (y, log_det_J) with y.shape == x.shape and log_det_J a scalar.
    """
    B, D = x.shape
    assert scale.shape == (1, D)

    scale_f32 = scale.astype(jnp.float32)
    # Log-det is independent of `reverse`; trivial reduction stays in XLA.
    log_det_J = jnp.sum(scale_f32)

    # Lane-dense relayout so the kernel's last dim is a multiple of 128.
    r, Dd = _lane_dense_layout(B, D)
    if r > 1:
        x_k = x.reshape(B // r, Dd)
        scale_k = jnp.tile(scale_f32, (1, r))
    else:
        x_k = x
        scale_k = scale_f32
    Bk = x_k.shape[0]

    sign = jnp.full((1,), -1.0 if reverse else 1.0, dtype=jnp.float32)

    TB = _pick_batch_tile(Bk, Dd, x.dtype)
    grid = (pl.cdiv(Bk, TB),)

    extra_kwargs = {}
    if donate_x:
        # x is input index 1 (after the SMEM sign scalar); shapes/dtypes match.
        extra_kwargs["input_output_aliases"] = {1: 0}

    y = pl.pallas_call(
        _scaling_kernel,
        out_shape=jax.ShapeDtypeStruct((Bk, Dd), x.dtype),
        grid=grid,
        in_specs=[
            pl.BlockSpec(memory_space=pltpu.MemorySpace.SMEM),  # sign scalar
            pl.BlockSpec((TB, Dd), lambda i: (i, 0)),           # x: tiled over batch
            pl.BlockSpec((1, Dd), lambda i: (0, 0)),            # scale row: resident
        ],
        out_specs=pl.BlockSpec((TB, Dd), lambda i: (i, 0)),
        compiler_params=pltpu.CompilerParams(
            dimension_semantics=_batch_dim_semantics(grid[0]),
            # Covers the ~4x double-buffered footprint of a 4 MiB block and
            # lifts v5e's 16 MiB default scoped-VMEM limit (physical >= 64 MiB).
            vmem_limit_bytes=32 * 1024 * 1024,
        ),
        **extra_kwargs,
    )(sign, x_k, scale_k)

    if r > 1:
        y = y.reshape(B, D)
    return y, log_det_J


def _check(B, D, key):
    kx, ks = jax.random.split(key)
    x = jax.random.normal(kx, (B, D), dtype=jnp.float32)
    # nn.Parameter(torch.zeros((1, dim))): zeros would make the op an identity,
    # so use small deterministic values to actually exercise the math.
    scale = 0.1 * jax.random.normal(ks, (1, D), dtype=jnp.float32)

    y, logdet = scaling_forward(x, scale, reverse=False)
    y_rev, logdet_rev = scaling_forward(x, scale, reverse=True)
    y = jax.block_until_ready(y)
    y_rev = jax.block_until_ready(y_rev)
    logdet = jax.block_until_ready(logdet)
    logdet_rev = jax.block_until_ready(logdet_rev)

    y_ref = x * jnp.exp(scale)
    y_rev_ref = x * jnp.exp(-scale)
    ld_ref = jnp.sum(scale)
    assert jnp.allclose(y, y_ref, atol=1e-6, rtol=1e-6)
    assert jnp.allclose(y_rev, y_rev_ref, atol=1e-6, rtol=1e-6)
    assert jnp.allclose(logdet, ld_ref, atol=1e-6, rtol=1e-6)
    assert jnp.allclose(logdet_rev, ld_ref, atol=1e-6, rtol=1e-6)


if __name__ == "__main__":
    key = jax.random.PRNGKey(0)
    k1, k2, k3 = jax.random.split(key, 3)

    # Primary shape consistent with the module: (batch=8, dim=32).
    # D=32 -> lane-dense relayout (r=4): kernel sees (2, 128).
    _check(8, 32, k1)

    # Ragged fallback path (B not divisible by r): full-dim block, masked stores.
    _check(6, 32, k2)

    # Already lane-dense D (multiple of 128): no relayout.
    _check(16, 128, k3)

    print("KERNEL_OK")
</pallas_src>

<mosaic_0001>
module attributes {stable_mosaic.version = 11 : i64} {
  func.func @_scaling_kernel(%arg0: i32, %arg1: memref<1xf32, #tpu.memory_space<smem>>, %arg2: memref<2x128xf32, #tpu.memory_space<vmem>>, %arg3: memref<1x128xf32, #tpu.memory_space<vmem>>, %arg4: memref<2x128xf32, #tpu.memory_space<vmem>>) attributes {dimension_semantics = [#tpu.dimension_semantics<parallel>], iteration_bounds = array<i64: 1>, scalar_prefetch = 0 : i64, scratch_operands = 0 : i64, tpu.core_type = #tpu.core_type<tc>, window_params = [{transform_indices = @transform_0, window_bounds = array<i64: 1>}, {transform_indices = @transform_1, window_bounds = array<i64: 2, 128>}, {pipeline_mode = #tpu.pipeline_mode<synchronous>, transform_indices = @transform_2, window_bounds = array<i64: 1, 128>}, {transform_indices = @transform_3, window_bounds = array<i64: 2, 128>}]} {
    %c0 = arith.constant 0 : index
    %0 = memref.load %arg1[%c0] : memref<1xf32, #tpu.memory_space<smem>>
    %c0_0 = arith.constant 0 : index
    %c0_1 = arith.constant 0 : index
    %1 = vector.load %arg3[%c0_0, %c0_1] : memref<1x128xf32, #tpu.memory_space<vmem>>, vector<1x128xf32>
    %2 = vector.broadcast %0 : f32 to vector<1x128xf32>
    %3 = arith.mulf %2, %1 : vector<1x128xf32>
    %4 = math.exp %3 : vector<1x128xf32>
    %c0_2 = arith.constant 0 : index
    %c0_3 = arith.constant 0 : index
    %5 = vector.load %arg2[%c0_2, %c0_3] : memref<2x128xf32, #tpu.memory_space<vmem>>, vector<2x128xf32>
    %6 = vector.broadcast %4 : vector<1x128xf32> to vector<2x128xf32>
    %7 = arith.mulf %5, %6 : vector<2x128xf32>
    %c0_4 = arith.constant 0 : index
    %c0_5 = arith.constant 0 : index
    %8 = vector.load %arg4[%c0_4, %c0_5] : memref<2x128xf32, #tpu.memory_space<vmem>>, vector<2x128xf32>
    tpu.vector_store %arg4[%c0_4, %c0_5], %7 {strides = array<i32>} : memref<2x128xf32, #tpu.memory_space<vmem>>, vector<2x128xf32>,
    return
  }
  func.func @transform_0(%arg0: i32) -> i32 {
    %c0_i32 = arith.constant 0 : i32
    %c0_i32_0 = arith.constant 0 : i32
    return %c0_i32 : i32
  }
  func.func @transform_1(%arg0: i32) -> (i32, i32) {
    %c0_i32 = arith.constant 0 : i32
    %c0_i32_0 = arith.constant 0 : i32
    return %arg0, %c0_i32 : i32, i32
  }
  func.func @transform_2(%arg0: i32) -> (i32, i32) {
    %c0_i32 = arith.constant 0 : i32
    %c0_i32_0 = arith.constant 0 : i32
    %c0_i32_1 = arith.constant 0 : i32
    return %c0_i32, %c0_i32_0 : i32, i32
  }
  func.func @transform_3(%arg0: i32) -> (i32, i32) {
    %c0_i32 = arith.constant 0 : i32
    %c0_i32_0 = arith.constant 0 : i32
    return %arg0, %c0_i32 : i32, i32
  }
}

</mosaic_0001>

<bundles_post_ra>
// kernel: tpu_custom_call.1
= control target key start
LH: loop header
LB: loop body
LE: loop exit
PB: predicated region body
PF: predicated region fallthrough
CT: control target
= control target key end

     0   :  { %s103_s0 = inlined_call_operand.<no memory space> [shape: f32[1], index: 0, kind: input, shape index: {}]   ;;  %s104_s1 = inlined_call_operand.vmem [shape: f32[2,128], index: 1, kind: input, shape index: {}]   ;;  %s105_s2 = inlined_call_operand.vmem [shape: f32[1,128], index: 2, kind: input, shape index: {}]   ;;  %s106_s3 = inlined_call_operand.hbm [shape: f32[2,128], index: 3, kind: output, shape index: {}]  }
   0x1   :  { %v17_v0 = vld [vmem:[%s105_s2] sm:$0x1]  ;;  %v18_v1 = vstv %s103_s0 }
   0x2   :  { %9 = vsyncpa [#allocation4], 0  ;;  %v19_v2 = vmul.f32 %v18_v1, %v17_v0  ;;  %v24_v4 = vlaneseq  ;;  %v22_v8 = vld [vmem:[%s104_s1] sm:$0x3]  ;;  %s70_s18 = smov [#allocation3]  }
   0x3   :  { %s37_s19 = sshll.u32 %s70_s18, 4  ;;  %s38_s19 = int_to_ptr.vmem [resolvable:$true] %s37_s19 }
   0x4   :  { %v20_v3 = vmul.f32 1.442695, %v19_v2  ;;  %v25_v5 = vshrl.u32 %v24_v4, 7  ;;  %s48_s2 = scalar_lea.vmem %s38_s19, 32  ;;  %p53_p1 = scmp.lt.s32.totalorder %s38_s19, %s38_s19 }
   0x5   :  { %p49_p0 = scmp.ne.s32.totalorder %s38_s19, %s48_s2  ;;  %p54_p2 = scmp.lt.s32.totalorder %s48_s2, %s48_s2 }
   0x6   :  { %46 = vpow2.f32 %v20_v3  ;;  %v26_v6 = vsub.s32 0, %v25_v5 }
   0x7   :  { %p55_p3 = por %p54_p2, %p53_p1 }
   0x9   :  { %p56_p4 = pnand %p55_p3, %p49_p0 }
  0x13   :  { %v47_v7 = vpop.eup %46 }
  0x14   :  { %v27_v9 = vrot.slane %v47_v7, %v26_v6 }
  0x16   :  { %v29_v10 = vmul.f32 %v27_v9, %v22_v8 }
  0x18   :  { %30 = vst [vmem:[#allocation3] sm:$0x3] %v29_v10 }
  0x19   :  { %59 = shalt.err (!%p56_p4)
}
  0x1a   :  { %40 = dma.vmem_to_hbm [thread:$0]  %s38_s19, 32, %s106_s3, [#allocation4]  }
  0x1b   :  { %68 = dma.done.wait [#allocation4], 32  }
  0x1c   :  { %69 = vsyncadd [#allocation4], 4294967264 }
  0x1d   :  { %44 = vsyncpa [#allocation4], 1 }

</bundles_post_ra>
